<compile_context>
chip_gen: v6e
topology: v6e:2x2x1
jax: 0.10.0
libtpu: 0.0.40
codegen_flags: <defaults>
</compile_context>

<pallas_src>
import jax
import jax.numpy as jnp
from jax.experimental import pallas as pl
from jax.experimental.pallas import tpu as pltpu


def _pick_batch_block(n: int, row_bytes: int, target_bytes: int = 2 * 1024 * 1024) -> int:
    """Largest batch block keeping the per-step input DMA around <= ~2 MiB.

    Prefers the full batch (always layout-legal); otherwise the largest divisor of `n`
    that is a multiple of 8 (keeps the block sublane-aligned)."""
    if n * row_bytes <= target_bytes:
        return n
    best = 0
    bn = 8
    while bn < n:
        if n % bn == 0 and bn * row_bytes <= target_bytes:
            best = bn
        bn += 8
    return best if best else n


def _make_adjacency_kernel(c_in: int, length: int, ksize: int, bn: int):
    """Per-(vertex, batch-block) kernel body; static shapes captured by closure."""
    pad = (ksize - 1) // 2
    cl = c_in * length

    def kernel(x_ref, w_ref, b_ref, o_ref):
        # x_ref: (Bn, C*L)  input slab, lane index = c*L + l
        # w_ref: (K,  C*L)  tap weights pre-broadcast along lanes (w_ref[k, c*L+l] = w[c,k])
        # b_ref: (1,  C*L)  bias pre-broadcast along lanes
        # o_ref: (Bn, C*L)  gated output slab
        xf = x_ref[...].astype(jnp.float32)              # hoisted cast, single pass over x

        # ---- channel reduction with cyclic lane rolls (XLU slot) -----------------------
        # After the loop every length-L lane block holds s[n, l] = sum_c x[n, c, l].
        s_tiled = xf
        if (c_in & (c_in - 1)) == 0:                     # power-of-two C: log2(C) steps
            for i in range(c_in.bit_length() - 1):
                s_tiled = s_tiled + pltpu.roll(s_tiled, length << i, axis=1)
        else:                                            # generic C: C-1 steps
            for cc in range(1, c_in):
                s_tiled = s_tiled + pltpu.roll(xf, cc * length, axis=1)
        # NOTE: for C in the hundreds+ a ones(8,C) @ x MXU matmul would be cheaper.

        w = w_ref[...].astype(jnp.float32)               # (K, C*L), tiny
        b = b_ref[...].astype(jnp.float32)               # (1, C*L)

        # Centre tap (k == pad) + bias folded into the accumulator init.
        acc = b + w[pad:pad + 1, :] * s_tiled

        # Local position inside each length-L block (for the zero-padding masks).
        l_local = jax.lax.broadcasted_iota(jnp.int32, (bn, cl), 1) % length

        # Remaining taps: XLU roll + mask instead of unaligned lane slices; the mask
        # implements the conv zero padding in-kernel (no wrapper jnp.pad).
        for k in range(ksize):
            d = k - pad
            if d == 0:
                continue
            shifted = pltpu.roll(s_tiled, (-d) % cl, axis=1)   # lane l now holds s[l + d]
            valid = (l_local < length - d) if d > 0 else (l_local >= -d)
            acc = acc + w[k:k + 1, :] * jnp.where(valid, shifted, 0.0)

        # OutputAdjacencyMatrix gating: attention(x) * x, fused (x already resident in VMEM).
        o_ref[...] = (acc * xf).astype(o_ref.dtype)

    return kernel


def output_adjacency_matrix(x, weight, bias):
    """Gated per-vertex attention: out[v] = conv1d_attn_v(x[v]) * x[v].

    x: (V, N, C, L); weight: (V, O, 1, K) with O == C, K odd; bias: (V, O) -> (V, N, C, L).
    """
    # TODO(synk): the attention class is profile-injected (profile.model_reference);
    # the conv1d SE attention (_CommonConv1d semantics) from the prior round is used.
    v, n, c, l = x.shape
    _, o, _, k = weight.shape
    if o != c:
        raise ValueError("gating requires out_channels == in_channels")
    if k % 2 != 1:
        raise ValueError("'same' conv gating requires an odd kernel_size")
    cl = c * l

    # Layout plumbing only (free row-major reshapes / tiny broadcasts), no jnp.pad of x.
    x_flat = x.reshape(v, n, cl)                                      # (V, N, C*L)
    w_lanes = jnp.broadcast_to(
        jnp.transpose(weight[:, :, 0, :], (0, 2, 1))[:, :, :, None],  # (V, K, C, 1)
        (v, k, c, l)).reshape(v, k, cl)                               # (V, K, C*L)
    b_lanes = jnp.broadcast_to(
        bias[:, None, :, None], (v, 1, c, l)).reshape(v, 1, cl)       # (V, 1, C*L)

    row_bytes = cl * jnp.dtype(x.dtype).itemsize
    bn = _pick_batch_block(n, row_bytes)
    kernel = _make_adjacency_kernel(c, l, k, bn)

    out_flat = pl.pallas_call(
        kernel,
        out_shape=jax.ShapeDtypeStruct((v, n, cl), x.dtype),
        grid_spec=pltpu.PrefetchScalarGridSpec(
            num_scalar_prefetch=0,
            grid=(v, n // bn),
            in_specs=[
                pl.BlockSpec((None, bn, cl), lambda vi, bi: (vi, bi, 0)),
                pl.BlockSpec((None, k, cl), lambda vi, bi: (vi, 0, 0)),
                pl.BlockSpec((None, 1, cl), lambda vi, bi: (vi, 0, 0)),
            ],
            out_specs=pl.BlockSpec((None, bn, cl), lambda vi, bi: (vi, bi, 0)),
        ),
        compiler_params=pltpu.CompilerParams(
            dimension_semantics=("parallel", "parallel"),
            vmem_limit_bytes=32 * 1024 * 1024,
        ),
    )(x_flat, w_lanes, b_lanes)
    return out_flat.reshape(v, n, c, l)


def spider_output_layer(x, weight, bias):
    """SpiderOutputLayer forward: update(adjacency(x))."""
    adj = output_adjacency_matrix(x, weight, bias)
    # TODO(synk): `update` is a profile-injected module (profile.update_reference);
    # a sum-over-vertices aggregation is used as a stand-in here.
    return jnp.sum(adj, axis=0)


def _reference(x, weight, bias):
    """Pure-JAX mirror of the PyTorch forward (pad -> taps -> bias -> gate -> update)."""
    v, n, c, l = x.shape
    k = weight.shape[-1]
    pad = (k - 1) // 2
    xp = jnp.pad(x, ((0, 0), (0, 0), (0, 0), (pad, pad)))          # (V, N, C, L+2p)
    s = jnp.sum(xp, axis=2)                                        # (V, N, L+2p)
    adj = []
    for vi in range(v):
        se = jnp.zeros((n, c, l), jnp.float32)
        for kk in range(k):
            se = se + weight[vi, :, 0, kk][None, :, None] * s[vi, :, None, kk:kk + l]
        se = se + bias[vi][None, :, None]
        adj.append(se * x[vi])                                     # gating
    adj = jnp.stack(adj, axis=0)
    return adj, jnp.sum(adj, axis=0)


if __name__ == "__main__":
    # Small shapes consistent with the module's forward pass.
    vertexes = 3            # graph vertices (one attention model per vertex)
    batch = 8
    channels = 4            # O == C so the attention output can gate the input
    length = 32             # C * L = 128 -> lane-dense (Bn, 128) blocks
    kernel_size = 3

    key = jax.random.PRNGKey(0)
    kx, kw, kb = jax.random.split(key, 3)
    x = jax.random.uniform(kx, (vertexes, batch, channels, length), dtype=jnp.float32)
    weight = jax.random.uniform(kw, (vertexes, channels, 1, kernel_size), dtype=jnp.float32)
    bias = jax.random.uniform(kb, (vertexes, channels), dtype=jnp.float32)

    adj = output_adjacency_matrix(x, weight, bias)      # Pallas kernel output (adjacency)
    out = spider_output_layer(x, weight, bias)          # full SpiderOutputLayer forward
    adj, out = jax.block_until_ready((adj, out))

    adj_ref, out_ref = _reference(x, weight, bias)
    assert adj.shape == adj_ref.shape and out.shape == out_ref.shape
    assert jnp.allclose(adj, adj_ref, atol=1e-5, rtol=1e-5)
    assert jnp.allclose(out, out_ref, atol=1e-5, rtol=1e-5)

    print("KERNEL_OK")
</pallas_src>

<mosaic_0001>
module attributes {stable_mosaic.version = 11 : i64} {
  func.func @kernel(%arg0: i32, %arg1: i32, %arg2: memref<1x8x128xf32, #tpu.memory_space<vmem>>, %arg3: memref<1x3x128xf32, #tpu.memory_space<vmem>>, %arg4: memref<1x1x128xf32, #tpu.memory_space<vmem>>, %arg5: memref<1x8x128xf32, #tpu.memory_space<vmem>>) attributes {dimension_semantics = [#tpu.dimension_semantics<parallel>, #tpu.dimension_semantics<parallel>], iteration_bounds = array<i64: 3, 1>, scalar_prefetch = 0 : i64, scratch_operands = 0 : i64, tpu.core_type = #tpu.core_type<tc>, window_params = [{transform_indices = @transform_0, window_bounds = array<i64: 1, 8, 128>}, {transform_indices = @transform_1, window_bounds = array<i64: 1, 3, 128>}, {transform_indices = @transform_2, window_bounds = array<i64: 1, 1, 128>}, {transform_indices = @transform_3, window_bounds = array<i64: 1, 8, 128>}]} {
    %c0 = arith.constant 0 : index
    %c0_0 = arith.constant 0 : index
    %c0_1 = arith.constant 0 : index
    %0 = vector.load %arg2[%c0, %c0_0, %c0_1] : memref<1x8x128xf32, #tpu.memory_space<vmem>>, vector<1x8x128xf32>
    %1 = vector.shape_cast %0 : vector<1x8x128xf32> to vector<8x128xf32>
    %c32_i32 = arith.constant 32 : i32
    %2 = tpu.dynamic_rotate %1 by %c32_i32 dim 1 : vector<8x128xf32>, i32 -> vector<8x128xf32>
    %3 = arith.addf %1, %2 : vector<8x128xf32>
    %c64_i32 = arith.constant 64 : i32
    %4 = tpu.dynamic_rotate %3 by %c64_i32 dim 1 : vector<8x128xf32>, i32 -> vector<8x128xf32>
    %5 = arith.addf %3, %4 : vector<8x128xf32>
    %c0_2 = arith.constant 0 : index
    %c0_3 = arith.constant 0 : index
    %c0_4 = arith.constant 0 : index
    %6 = vector.load %arg3[%c0_2, %c0_3, %c0_4] : memref<1x3x128xf32, #tpu.memory_space<vmem>>, vector<1x3x128xf32>
    %7 = vector.shape_cast %6 : vector<1x3x128xf32> to vector<3x128xf32>
    %c0_5 = arith.constant 0 : index
    %c0_6 = arith.constant 0 : index
    %c0_7 = arith.constant 0 : index
    %8 = vector.load %arg4[%c0_5, %c0_6, %c0_7] : memref<1x1x128xf32, #tpu.memory_space<vmem>>, vector<1x1x128xf32>
    %9 = vector.shape_cast %8 : vector<1x1x128xf32> to vector<1x128xf32>
    %10 = vector.extract_strided_slice %7 {offsets = [1, 0], sizes = [1, 128], strides = [1, 1]} : vector<3x128xf32> to vector<1x128xf32>
    %11 = vector.broadcast %10 : vector<1x128xf32> to vector<8x128xf32>
    %12 = arith.mulf %11, %5 : vector<8x128xf32>
    %13 = vector.broadcast %9 : vector<1x128xf32> to vector<8x128xf32>
    %14 = arith.addf %13, %12 : vector<8x128xf32>
    %15 = tpu.iota {dimensions = array<i32: 1>} : vector<8x128xi32>
    %c32_i32_8 = arith.constant 32 : i32
    %c0_i32 = arith.constant 0 : i32
    %16 = arith.cmpi eq, %c32_i32_8, %c0_i32 : i32
    %c1_i32 = arith.constant 1 : i32
    %17 = arith.select %16, %c1_i32, %c32_i32_8 : i32
    %18 = vector.broadcast %17 : i32 to vector<8x128xi32>
    %19 = arith.remsi %15, %18 : vector<8x128xi32>
    %c0_i32_9 = arith.constant 0 : i32
    %20 = vector.broadcast %c0_i32_9 : i32 to vector<8x128xi32>
    %21 = arith.cmpi ne, %19, %20 : vector<8x128xi32>
    %c0_i32_10 = arith.constant 0 : i32
    %22 = vector.broadcast %c0_i32_10 : i32 to vector<8x128xi32>
    %23 = arith.cmpi slt, %19, %22 : vector<8x128xi32>
    %c0_i32_11 = arith.constant 0 : i32
    %24 = arith.cmpi slt, %17, %c0_i32_11 : i32
    %25 = vector.broadcast %24 : i1 to vector<8x128xi1>
    %26 = vector.broadcast %25 : vector<8x128xi1> to vector<8x128xi1>
    %27 = arith.xori %23, %26 : vector<8x128xi1>
    %28 = arith.andi %27, %21 : vector<8x128xi1>
    %29 = vector.broadcast %17 : i32 to vector<8x128xi32>
    %30 = arith.addi %19, %29 : vector<8x128xi32>
    %31 = arith.select %28, %30, %19 : vector<8x128xi1>, vector<8x128xi32>
    %c1_i32_12 = arith.constant 1 : i32
    %32 = tpu.dynamic_rotate %5 by %c1_i32_12 dim 1 : vector<8x128xf32>, i32 -> vector<8x128xf32>
    %c1_i32_13 = arith.constant 1 : i32
    %33 = vector.broadcast %c1_i32_13 : i32 to vector<8x128xi32>
    %34 = arith.cmpi sge, %31, %33 : vector<8x128xi32>
    %35 = vector.extract_strided_slice %7 {offsets = [0, 0], sizes = [1, 128], strides = [1, 1]} : vector<3x128xf32> to vector<1x128xf32>
    %cst = arith.constant 0.000000e+00 : f32
    %36 = vector.broadcast %cst : f32 to vector<8x128xf32>
    %37 = arith.select %34, %32, %36 : vector<8x128xi1>, vector<8x128xf32>
    %38 = vector.broadcast %35 : vector<1x128xf32> to vector<8x128xf32>
    %39 = arith.mulf %38, %37 : vector<8x128xf32>
    %40 = arith.addf %14, %39 : vector<8x128xf32>
    %c127_i32 = arith.constant 127 : i32
    %41 = tpu.dynamic_rotate %5 by %c127_i32 dim 1 : vector<8x128xf32>, i32 -> vector<8x128xf32>
    %c31_i32 = arith.constant 31 : i32
    %42 = vector.broadcast %c31_i32 : i32 to vector<8x128xi32>
    %43 = arith.cmpi slt, %31, %42 : vector<8x128xi32>
    %44 = vector.extract_strided_slice %7 {offsets = [2, 0], sizes = [1, 128], strides = [1, 1]} : vector<3x128xf32> to vector<1x128xf32>
    %cst_14 = arith.constant 0.000000e+00 : f32
    %45 = vector.broadcast %cst_14 : f32 to vector<8x128xf32>
    %46 = arith.select %43, %41, %45 : vector<8x128xi1>, vector<8x128xf32>
    %47 = vector.broadcast %44 : vector<1x128xf32> to vector<8x128xf32>
    %48 = arith.mulf %47, %46 : vector<8x128xf32>
    %49 = arith.addf %40, %48 : vector<8x128xf32>
    %50 = arith.mulf %49, %1 : vector<8x128xf32>
    %c0_15 = arith.constant 0 : index
    %c0_16 = arith.constant 0 : index
    %c0_17 = arith.constant 0 : index
    %51 = vector.load %arg5[%c0_15, %c0_16, %c0_17] : memref<1x8x128xf32, #tpu.memory_space<vmem>>, vector<1x8x128xf32>
    %52 = vector.shape_cast %51 : vector<1x8x128xf32> to vector<8x128xf32>
    %53 = vector.shape_cast %50 : vector<8x128xf32> to vector<1x8x128xf32>
    tpu.vector_store %arg5[%c0_15, %c0_16, %c0_17], %53 {strides = array<i32>} : memref<1x8x128xf32, #tpu.memory_space<vmem>>, vector<1x8x128xf32>,
    return
  }
  func.func @transform_0(%arg0: i32, %arg1: i32) -> (i32, i32, i32) {
    %c0_i32 = arith.constant 0 : i32
    %c0_i32_0 = arith.constant 0 : i32
    return %arg0, %arg1, %c0_i32 : i32, i32, i32
  }
  func.func @transform_1(%arg0: i32, %arg1: i32) -> (i32, i32, i32) {
    %c0_i32 = arith.constant 0 : i32
    %c0_i32_0 = arith.constant 0 : i32
    %c0_i32_1 = arith.constant 0 : i32
    return %arg0, %c0_i32, %c0_i32_0 : i32, i32, i32
  }
  func.func @transform_2(%arg0: i32, %arg1: i32) -> (i32, i32, i32) {
    %c0_i32 = arith.constant 0 : i32
    %c0_i32_0 = arith.constant 0 : i32
    %c0_i32_1 = arith.constant 0 : i32
    return %arg0, %c0_i32, %c0_i32_0 : i32, i32, i32
  }
  func.func @transform_3(%arg0: i32, %arg1: i32) -> (i32, i32, i32) {
    %c0_i32 = arith.constant 0 : i32
    %c0_i32_0 = arith.constant 0 : i32
    return %arg0, %arg1, %c0_i32 : i32, i32, i32
  }
}

</mosaic_0001>

<bundles_post_ra>
// kernel: tpu_custom_call.1
= control target key start
LH: loop header
LB: loop body
LE: loop exit
PB: predicated region body
PF: predicated region fallthrough
CT: control target
= control target key end

     0   :  { %8 = vsyncpa [#allocation3], 0  ;;  %s866_s0 = inlined_call_operand.hbm [shape: f32[3,8,128], index: 0, kind: input, shape index: {}]   ;;  %s867_s1 = inlined_call_operand.hbm [shape: f32[3,3,128], index: 1, kind: input, shape index: {}]   ;;  %s868_s2 = inlined_call_operand.vmem [shape: f32[3,1,128], index: 2, kind: input, shape index: {}]   ;;  %s869_s3 = inlined_call_operand.hbm [shape: f32[3,8,128], index: 3, kind: output, shape index: {}]  }
   0x1   :  { %10 = vsyncpa [#allocation3 + $0x1], 0 }
   0x2   :  { %11 = vsyncpa [#allocation6], 0 }
   0x3   :  { %13 = vsyncpa [#allocation6 + $0x1], 0 }
   0x4   :  { %14 = vsyncpa [#allocation4], 0 }
   0x5   :  { %16 = vsyncpa [#allocation4 + $0x1], 0  ;;  %s695_s12 = smov 0   ;;  %s697_s13 = smov 0  }
   0x6   :  { %s699_s14 = smov 0   ;;  %s701_s15 = smov 0  }
   0x7   :  { %s703_s16 = smov 0   ;;  %s705_s17 = smov 0  }
   0x8 LB: > { %s438_s18 = sadd.s32 4294967295, %s666_s17   ;;  %s439_s19 = sadd.s32 4294967294, %s666_s17   ;;  %s666_s17 = sphi %s705_s17, %s22_s17   ;;  %s662_s16 = sphi %s703_s16, %s880_s16   ;;  %s658_s15 = sphi %s701_s15, %s879_s15   ;;  %s654_s14 = sphi %s699_s14, %s878_s14   ;;  %s650_s13 = sphi %s697_s13, %s877_s13   ;;  %s646_s12 = sphi %s695_s12, %s876_s12  }
   0x9   : > { %s34_s20 = sadd.s32 1, %s662_s16  ;;  %s43_s21 = sadd.s32 1, %s654_s14 }
   0xa   : > { %p36_p0 = scmp.ge.s32.totalorder %s34_s20, 3  ;;  %p50_p1 = scmp.ne.s32.totalorder %s654_s14, %s650_s13 }
   0xb   : > { %p51_p2 = scmp.eq.s32.totalorder %s666_s17, 0  ;;  %p56_p3 = scmp.ne.s32.totalorder %s650_s13, %s646_s12 }
   0xc   : > { %s882_s20 = smov (%p36_p0, %s34_s20), 0  ;;  %p57_p5 = scmp.eq.s32.totalorder %s438_s18, 0 }
   0xd   : > { %p736_p4 = por %p51_p2, %p50_p1  ;;  %s38_s23 = ssub.s32 %s662_s16, %s882_s20 }
   0xe   : > { %p134_p6 = scmp.eq.s32.totalorder %s438_s18, 2  ;;  %p41_p7 = scmp.eq.s32.totalorder %s38_s23, 0 }
   0xf   : > { %p742_p8 = por %p57_p5, %p56_p3  ;;  %p140_p10 = scmp.eq.s32.totalorder %s439_s19, 2 }
  0x10   : > { %p746_p9 = por %p134_p6, %p50_p1  ;;  %p472_p12 = scmp.lt.s32.totalorder %s666_s17, 3 }
  0x11   : > { %s751_s26 = scalar_select %p41_p7, %s654_s14, %s43_s21  }
  0x12   : > { %p753_p11 = por %p140_p10, %p56_p3  ;;  %s759_s28 = sand.u32 1, %s654_s14  }
  0x13   : > { %s442_s29 = sshll.u32 %s759_s28, 3  ;;  %s443_s30 = sshll.u32 %s662_s16, 7 }
  0x14   : > { %s170_s6 = scalar_lea.hbm %s866_s0, %s443_s30  ;;  %s164_s7 = scalar_lea.vmem [#allocation2], %s442_s29 }
  0x15   : > { %s172_s8 = sshll.u32 %s164_s7, 4  ;;  %p768_p13 = pnand %p472_p12, %p736_p4  ;;  %s173_s8 = int_to_ptr.vmem [resolvable:$true] %s172_s8 }
  0x16   : > { %p446_p0 = scmp.ge.s32.totalorder %s666_s17, 1  ;;  %p201_p1 = scmp.lt.s32.totalorder %s666_s17, 4 }
  0x17   : > { %s161_s10 = scalar_lea.sflag [#allocation3], %s759_s28  ;;  %p528_p2 = pneg %p768_p13 }
  0x18   : > { %s539_s11 = scalar_lea.vmem %s173_s8, 128  ;;  %s668_s18 = smov [#allocation2]  }
  0x19   : > { %p540_p3 = scmp.ne.s32.totalorder %s173_s8, %s539_s11  ;;  %s544_s19 = sshll.u32 %s668_s18, 4  ;;  %s545_s19 = int_to_ptr.vmem [resolvable:$false] %s544_s19 }
  0x1a   : > { %s546_s21 = scalar_lea.vmem %s545_s19, 256  ;;  %p547_p4 = scmp.lt.s32.totalorder %s173_s8, %s545_s19 }
  0x1b   : > { %p542_p5 = pnand %p540_p3, %p528_p2  ;;  %p548_p7 = scmp.lt.s32.totalorder %s546_s21, %s539_s11 }
  0x1d   : > { %p543_p6 = pneg %p542_p5  ;;  %p549_p10 = por %p548_p7, %p547_p4 }
  0x1f   : > { %p550_p12 = pnand %p549_p10, %p543_p6 }
  0x21   : > { %553 = shalt.err (!%p550_p12)
}
  0x22   : > { %464 = dma.hbm_to_vmem [thread:$0]  (!%p768_p13), %s170_s6, 128, %s173_s8, %s161_s10  }
  0x23   : > { %p786_p3 = pnand %p446_p0, %p201_p1  ;;  %s444_s23 = sshll.u32 %s759_s28, 2 }
  0x24   : > { %s445_s29 = sshll.u32 %s662_s16, 6  ;;  %s183_s7 = scalar_lea.vmem [#allocation5], %s444_s23 }
  0x25   : > { %s188_s5 = scalar_lea.hbm %s867_s1, %s445_s29  ;;  %s190_s11 = sshll.u32 %s183_s7, 4  ;;  %s191_s11 = int_to_ptr.vmem [resolvable:$true] %s190_s11 }
  0x26   : > { %s180_s18 = scalar_lea.sflag [#allocation6], %s759_s28  ;;  %s567_s19 = scalar_lea.vmem %s191_s11, 64 }
  0x27   : > { %p568_p5 = scmp.ne.s32.totalorder %s191_s11, %s567_s19  ;;  %s669_s6 = smov [#allocation5]  }
  0x28   : > { %s572_s8 = sshll.u32 %s669_s6, 4  ;;  %s573_s8 = int_to_ptr.vmem [resolvable:$false] %s572_s8 }
  0x29   : > { %p570_p6 = pnand %p568_p5, %p528_p2  ;;  %s574_s10 = scalar_lea.vmem %s573_s8, 128 }
  0x2a   : > { %p575_p0 = scmp.lt.s32.totalorder %s191_s11, %s573_s8  ;;  %p576_p1 = scmp.lt.s32.totalorder %s574_s10, %s567_s19 }
  0x2b   : > { %p571_p4 = pneg %p570_p6 }
  0x2c   : > { %p577_p7 = por %p576_p1, %p575_p0 }
  0x2e   : > { %p578_p10 = pnand %p577_p7, %p571_p4 }
  0x30   : > { %581 = shalt.err (!%p578_p10)
}
  0x31   : > { %467 = dma.hbm_to_vmem [thread:$0]  (!%p768_p13), %s188_s5, 64, %s191_s11, %s180_s18  }
  0x32   : > { %205 = sbr.rel (%p786_p3) target bundleno = 433 (0x1b1), region = 32  ;;  %s804_s28 = sand.u32 (!%p786_p3), 1, %s650_s13  }
  0x33   : > { %s447_s21 = sshll.u32 (!%p786_p3), %s804_s28, 3  ;;  %s208_s23 = scalar_lea.sflag (!%p786_p3), [#allocation3], %s804_s28 }
  0x34   : > { %s211_s29 = scalar_lea.vmem (!%p786_p3), [#allocation2], %s447_s21 }
  0x37   : > { %633 = dma.done.wait (%p742_p8), %s208_s23, 128  }
  0x38   : > { %635 = vsyncadd (%p742_p8), %s208_s23, 4294967168  ;;  %s448_s9 = sshll.u32 %s804_s28, 2  ;;  %s217_s22 = scalar_lea.sflag [#allocation6], %s804_s28 }
  0x39   : > { %s220_s30 = scalar_lea.vmem [#allocation5], %s448_s9 }
  0x3a   : > { %637 = dma.done.wait (%p742_p8), %s217_s22, 64  }
  0x3b   : > { %639 = vsyncadd (%p742_p8), %s217_s22, 4294967232  ;;  %v254_v0 = vld [vmem:[%s211_s29] sm:$0xff]  ;;  %s670_s4 = smov 32   ;;  %s671_s5 = smov 64   ;;  %v263_v5 = vlaneseq  ;;  %v261_v9 = vld [vmem:[%s220_s30] sm:$0x7] }
  0x3c   : > { %255 = vrot.lane.b32.xlu0 %v254_v0, %s670_s4  ;;  %s672_s7 = smov 1   ;;  %s673_s11 = smov 127  }
  0x3d   : > { %v264_v6 = vshrl.u32 %v263_v5, 7  ;;  %p251_p13 = scmp.lt.s32.totalorder %s658_s15, 2  ;;  %v276_v7 = vand.u32 127, %v263_v5  ;;  %s452_s8 = sshll.u32 %s658_s15, 7 }
  0x3e   : > { %s250_s10 = scalar_lea.vmem [#allocation7], %s447_s21  ;;  %s324_s22 = scalar_lea.hbm %s869_s3, %s452_s8 }
  0x3f   : > { %v265_v8 = vsub.s32 1, %v264_v6  ;;  %s252_s24 = scalar_select %p251_p13, %s658_s15, 2  ;;  %v281_v10 = vand.u32 31, %v276_v7  ;;  %v295_v11 = vsub.s32 0, %v264_v6  ;;  %v305_v14 = vsub.s32 2, %v264_v6 }
  0x40   : > { %s326_s23 = sshll.u32 %s250_s10, 4  ;;  %s312_s30 = scalar_lea.sflag [#allocation4], %s804_s28  ;;  %s327_s23 = int_to_ptr.vmem [resolvable:$true] %s326_s23 }
  0x41   : > { %v266_v12 = vrot.slane %v261_v9, %v265_v8  ;;  %s253_s6 = scalar_lea.vmem %s868_s2, %s252_s24  ;;  %vm291_vm0 = vcmp.ge.s32.totalorder %v281_v10, 1  ;;  %v296_v13 = vrot.slane %v261_v9, %v295_v11  ;;  %vm301_vm1 = vcmp.lt.s32.totalorder %v281_v10, 31  ;;  %s582_s4 = scalar_lea.vmem %s327_s23, 128 }
  0x42   : > { %v450_v17 = vld [vmem:[%s253_s6] ss:$0 sm:$0xff]  ;;  %v306_v20 = vrot.slane %v261_v9, %v305_v14  ;;  %p583_p8 = scmp.ne.s32.totalorder %s327_s23, %s582_s4 }
  0x44   : > { %p584_p2 = pnand %p583_p8, %p746_p9 }
  0x46   : > { %p585_p12 = pneg %p584_p2 }
  0xae   : > { %v256_v1 = vpop.permute.xlu0 %255 }
  0xaf   : > { %v257_v2 = vadd.f32 %v256_v1, %v254_v0 }
  0xb1   : > { %258 = vrot.lane.b32.xlu0 %v257_v2, %s671_s5  ;;  %s674_s5 = smov [#allocation7]  }
 0x123   : > { %v259_v3 = vpop.permute.xlu0 %258 }
 0x124   : > { %v260_v4 = vadd.f32 %v259_v3, %v257_v2 }
 0x126   : > { %289 = vrot.lane.b32.xlu1 %v260_v4, %s672_s7  ;;  %v267_v15 = vmul.f32 %v266_v12, %v260_v4  ;;  %s586_s7 = sshll.u32 %s674_s5, 4  ;;  %s587_s7 = int_to_ptr.vmem [resolvable:$false] %s586_s7 }
 0x127   : > { %s588_s15 = scalar_lea.vmem %s587_s7, 256  ;;  %p589_p3 = scmp.lt.s32.totalorder %s327_s23, %s587_s7 }
 0x128   : > { %v274_v21 = vadd.f32 %v450_v17, %v267_v15  ;;  %p590_p5 = scmp.lt.s32.totalorder %s588_s15, %s582_s4 }
 0x12a   : > { %299 = vrot.lane.b32.xlu1 %v260_v4, %s673_s11  ;;  %p591_p6 = por %p590_p5, %p589_p3 }
 0x12c   : > { %p592_p4 = pnand %p591_p6, %p585_p12 }
 0x198   : > { %v290_v16 = vpop.permute.xlu1 %289 }
 0x199   : > { %v292_v18 = vsel %vm291_vm0, %v290_v16, 0.0 }
 0x19a   : > { %v297_v19 = vmul.f32 %v296_v13, %v292_v18 }
 0x19c   : > { %v300_v22 = vpop.permute.xlu1 %299  ;;  %v298_v24 = vadd.f32 %v297_v19, %v274_v21 }
 0x19d   : > { %v302_v23 = vsel %vm301_vm1, %v300_v22, 0.0 }
 0x19e   : > { %v307_v25 = vmul.f32 %v306_v20, %v302_v23 }
 0x1a0   : > { %v308_v26 = vadd.f32 %v307_v25, %v298_v24 }
 0x1a2   : > { %v309_v27 = vmul.f32 %v308_v26, %v254_v0 }
 0x1a4   : > { %310 = vst [vmem:[%s250_s10] sm:$0xff] %v309_v27 }
 0x1a5   : > { %595 = shalt.err (!%p592_p4)
}
 0x1a6   : > { %s596_s21 = scalar_lea.hbm %s324_s22, 128  ;;  %s600_s24 = scalar_lea.hbm %s869_s3, 384 }
 0x1a7   : > { %p597_p0 = scmp.ne.s32.totalorder %s324_s22, %s596_s21  ;;  %p601_p10 = scmp.lt.s32.totalorder %s324_s22, %s869_s3 }
 0x1a8   : > { %p602_p13 = scmp.lt.s32.totalorder %s600_s24, %s596_s21 }
 0x1a9   : > { %p598_p1 = pnand %p597_p0, %p746_p9 }
 0x1aa   : > { %p603_p8 = por %p602_p13, %p601_p10 }
 0x1ab   : > { %p599_p7 = pneg %p598_p1 }
 0x1ad   : > { %p604_p2 = pnand %p603_p8, %p599_p7 }
 0x1af   : > { %607 = shalt.err (!%p604_p2)
}
 0x1b0   : > { %459 = dma.vmem_to_hbm [thread:$0]  (%p746_p9), %s327_s23, 128, %s324_s22, %s312_s30  }
 0x1b1 PF: > { %p473_p12 = scmp.ge.s32.totalorder %s666_s17, 2  ;;  %s338_s6 = sand.u32 1, %s646_s12  }
 0x1b2   : > { %s339_s8 = scalar_lea.sflag [#allocation4], %s338_s6 }
 0x1b3   : > { %p469_p3 = pnand %p473_p12, %p753_p11 }
 0x1b5   : > { %p470_p5 = pneg %p469_p3 }
 0x1b7   : > { %641 = dma.done.wait (%p470_p5), %s339_s8, 128  }
 0x1b8   : > { %643 = vsyncadd (%p470_p5), %s339_s8, 4294967168  ;;  %s22_s17 = sadd.s32 1, %s666_s17   ;;  %s876_s12 = smov %s650_s13 }
 0x1b9   : > { %p19_p6 = scmp.ge.s32.totalorder %s22_s17, 5   ;;  %s877_s13 = smov %s654_s14 }
 0x1ba   : > { %s878_s14 = smov %s751_s26  ;;  %s879_s15 = smov %s662_s16 }
 0x1bb   : > { %s880_s16 = smov %s882_s20  ;;  %21 = sbr.rel (!%p19_p6) target bundleno = 8 (0x8), region = 93 }
 0x1c0   :  { %344 = vsyncpa [#allocation3], 1 }
 0x1c1   :  { %346 = vsyncpa [#allocation3 + $0x1], 1 }
 0x1c2   :  { %347 = vsyncpa [#allocation6], 1 }
 0x1c3   :  { %349 = vsyncpa [#allocation6 + $0x1], 1 }
 0x1c4   :  { %350 = vsyncpa [#allocation4], 1 }
 0x1c5   :  { %352 = vsyncpa [#allocation4 + $0x1], 1 }

</bundles_post_ra>
